<compile_context>
chip_gen: v7x
topology: tpu7x:2x2x1
jax: 0.10.0
libtpu: 0.0.40
codegen_flags: <defaults>
</compile_context>

<pallas_src>
import functools

import jax
import jax.numpy as jnp
from jax.experimental import pallas as pl
from jax.experimental.pallas import tpu as pltpu


_LANE = 128
_SUBLANE = 8
_VMEM_CEIL = 56 * 1024 * 1024     # v7x-safe ceiling (64 MiB physical VMEM)
_VMEM_TARGET = 48 * 1024 * 1024   # shrink the tile if footprint exceeds this


def _round_up(n, m):
    return ((n + m - 1) // m) * m


# --------------------------------------------------------------------------
# Kernels
# --------------------------------------------------------------------------

def _critic_kernel_fused(s_ref, a_ref, w_in_ref, b_in_ref, w_mid_ref,
                         b_mid_ref, w_head_ref, b_head_ref, q_ref):
    """Twin critic as 2 wide MXU dots (block-diag mid) + 1 tiny head dot.

    Output is lane-dense: q_ref is (2, blk) with row 0 = q1, row 1 = q2.
    """
    w_dt = w_in_ref.dtype

    # layer 1 (fc1 || fc3): in-kernel lane concat of [state, action], 1 dot.
    x = jnp.concatenate([s_ref[...], a_ref[...]], axis=1).astype(w_dt)
    h = jnp.dot(x, w_in_ref[...], preferred_element_type=jnp.float32)
    h = jnp.maximum(h + b_in_ref[...], 0.0).astype(w_dt)

    # layer 2 (block-diag of fc2 / fc4) — only used when 2H fits the MXU tile.
    g = jnp.dot(h, w_mid_ref[...], preferred_element_type=jnp.float32)
    g = jnp.maximum(g + b_mid_ref[...], 0.0).astype(w_dt)

    # heads folded into the transposed output path: (2, 2H2) x (blk, 2H2)^T
    # -> (2, blk), written with unmasked lane-dense stores.
    q = jax.lax.dot_general(w_head_ref[...], g,
                            (((1,), (1,)), ((), ())),
                            preferred_element_type=jnp.float32)
    q_ref[...] = (q + b_head_ref[...]).astype(q_ref.dtype)


def _critic_kernel_split(s_ref, a_ref, w_in_ref, b_in_ref, w2_ref, w4_ref,
                         b_mid_ref, w_head_ref, b_head_ref, q_ref):
    """Same network, but the mid layer runs as two zero-free dots.

    Used when 2*H exceeds the MXU width and block-diag packing would waste
    ~2x MXU FLOPs / weight DMA.
    """
    w_dt = w_in_ref.dtype
    H1 = w2_ref.shape[0]
    H2 = w2_ref.shape[1]

    x = jnp.concatenate([s_ref[...], a_ref[...]], axis=1).astype(w_dt)
    h = jnp.dot(x, w_in_ref[...], preferred_element_type=jnp.float32)
    h = jnp.maximum(h + b_in_ref[...], 0.0).astype(w_dt)     # (blk, 2*H1)

    b_mid = b_mid_ref[...]
    g1 = jnp.dot(h[:, :H1], w2_ref[...], preferred_element_type=jnp.float32)
    g2 = jnp.dot(h[:, H1:], w4_ref[...], preferred_element_type=jnp.float32)
    g1 = jnp.maximum(g1 + b_mid[:, :H2], 0.0)
    g2 = jnp.maximum(g2 + b_mid[:, H2:], 0.0)
    g = jnp.concatenate([g1, g2], axis=1).astype(w_dt)        # (blk, 2*H2)

    q = jax.lax.dot_general(w_head_ref[...], g,
                            (((1,), (1,)), ((), ())),
                            preferred_element_type=jnp.float32)
    q_ref[...] = (q + b_head_ref[...]).astype(q_ref.dtype)


# --------------------------------------------------------------------------
# Packing & tiling
# --------------------------------------------------------------------------

def pack_params(p, mxu_dtype=jnp.float32, mxu_width=256):
    """One-time packing of per-layer params into fused weights.

    Block-diagonal fusion of the mid layer / heads is only used when the
    doubled hidden widths fit a single MXU tile (<= mxu_width, 128 on v5e,
    256 on v6e/v7x); otherwise the zeros would double MXU time and weight DMA.
    """
    H1 = p["w1"].shape[1]
    H2 = p["w2"].shape[1]
    fused = bool(2 * H1 <= mxu_width and 2 * H2 <= mxu_width)

    w_in = jnp.concatenate([p["w1"], p["w3"]], axis=1)            # (D, 2H1)
    b_in = jnp.concatenate([p["b1"], p["b3"]], axis=1)            # (1, 2H1)
    b_mid = jnp.concatenate([p["b2"], p["b4"]], axis=1)           # (1, 2H2)

    # heads packed row-wise for the transposed (2, blk) output path.
    w_head = jnp.zeros((2, 2 * H2), jnp.float32)
    w_head = w_head.at[0, :H2].set(p["wq1"][:, 0])
    w_head = w_head.at[1, H2:].set(p["wq2"][:, 0])                # (2, 2H2)
    b_head = jnp.concatenate([p["bq1"], p["bq2"]], axis=1).T      # (2, 1)

    out = dict(
        fused=fused,
        w_in=w_in.astype(mxu_dtype),
        b_in=b_in,                                                # biases stay f32
        b_mid=b_mid,
        w_head=w_head.astype(mxu_dtype),
        b_head=b_head,
    )
    if fused:
        w_mid = jnp.zeros((2 * H1, 2 * H2), jnp.float32)
        w_mid = w_mid.at[:H1, :H2].set(p["w2"]).at[H1:, H2:].set(p["w4"])
        out["w_mid"] = w_mid.astype(mxu_dtype)
    else:
        out["w2"] = p["w2"].astype(mxu_dtype)
        out["w4"] = p["w4"].astype(mxu_dtype)
    return out


def _vmem_bytes(blk, d_in, h1x2, h2x2, w_bytes):
    f32 = 4
    io = 2 * blk * d_in * f32 + 2 * 2 * blk * f32         # double-buffered tiles
    inter = blk * (d_in + h1x2 + 2 * h2x2) * f32          # x, h, g live values
    return io + 2 * w_bytes + 2 * inter                   # 2x margin on intermediates


def _select_tile(B, block_b, d_in, h1x2, h2x2, w_bytes):
    """Pick a batch tile: lane-aligned, >=2 grid steps for large batches
    (both v7x TensorCores), footprint-limited for v7x's 64 MiB VMEM."""
    B8 = _round_up(B, _SUBLANE)
    if B8 <= 2 * _LANE:
        # tiny batch: one grid step covering the whole (8-padded) batch; the
        # (2, blk) output block is legal because blk == the full array dim.
        blk, B_pad = B8, B8
    else:
        cap = max(_LANE, _round_up(block_b, _LANE))
        blk = min(cap, _round_up(-(-B8 // 2), _LANE))      # aim for >= 2 steps
        while blk > _LANE and _vmem_bytes(blk, d_in, h1x2, h2x2, w_bytes) > _VMEM_TARGET:
            blk = max(_LANE, _round_up(blk // 2, _LANE))
        B_pad = _round_up(B, blk)
    est = _vmem_bytes(blk, d_in, h1x2, h2x2, w_bytes)
    vmem_limit = int(min(_VMEM_CEIL, max(est, 32 * 1024 * 1024)))
    return blk, B_pad, vmem_limit


# --------------------------------------------------------------------------
# pallas_call wrapper
# --------------------------------------------------------------------------

@functools.partial(jax.jit, static_argnames=("kernel", "block_b"))
def _run_kernel(state, action, weights, *, kernel, block_b):
    B, Ds = state.shape
    Da = action.shape[1]
    h1x2 = weights[0].shape[1]                 # w_in : (Ds+Da, 2*H1)
    h2x2 = weights[-2].shape[1]                # w_head: (2, 2*H2)
    w_bytes = sum(int(w.size) * w.dtype.itemsize for w in weights)

    blk, B_pad, vmem_limit = _select_tile(B, block_b, Ds + Da, h1x2, h2x2, w_bytes)

    if B_pad != B:
        state = jnp.pad(state, ((0, B_pad - B), (0, 0)))
        action = jnp.pad(action, ((0, B_pad - B), (0, 0)))

    grid = (B_pad // blk,)

    in_specs = [
        pl.BlockSpec((blk, Ds), lambda i: (i, 0)),   # state tile
        pl.BlockSpec((blk, Da), lambda i: (i, 0)),   # action tile
    ]
    # grid-invariant weights/biases: full-array blocks, same index every step.
    in_specs += [pl.BlockSpec(w.shape, lambda i: (0, 0)) for w in weights]
    out_spec = pl.BlockSpec((2, blk), lambda i: (0, i))   # lane-dense output

    q = pl.pallas_call(
        kernel,
        out_shape=jax.ShapeDtypeStruct((2, B_pad), jnp.float32),
        grid_spec=pltpu.PrefetchScalarGridSpec(
            num_scalar_prefetch=0,
            grid=grid,
            in_specs=in_specs,
            out_specs=out_spec,
        ),
        compiler_params=pltpu.CompilerParams(
            dimension_semantics=("parallel",),
            vmem_limit_bytes=vmem_limit),
    )(state, action, *weights)

    q = q[:, :B]
    return q[0][:, None], q[1][:, None]


def critic_forward(state, action, packed, *, block_b=4096):
    """Twin-critic forward pass. Returns (q1, q2), each of shape (batch, 1)."""
    if packed["fused"]:
        weights = (packed["w_in"], packed["b_in"], packed["w_mid"],
                   packed["b_mid"], packed["w_head"], packed["b_head"])
        kernel = _critic_kernel_fused
    else:
        weights = (packed["w_in"], packed["b_in"], packed["w2"], packed["w4"],
                   packed["b_mid"], packed["w_head"], packed["b_head"])
        kernel = _critic_kernel_split
    return _run_kernel(state, action, weights, kernel=kernel, block_b=block_b)


# --------------------------------------------------------------------------
# Reference / init / test
# --------------------------------------------------------------------------

def init_params(key, in_dim, fc1_dims, fc2_dims):
    """Deterministic init, PyTorch-nn.Linear-style U(-1/sqrt(fan_in), +...)."""
    def linear(key, fan_in, fan_out):
        kw, kb = jax.random.split(key)
        bound = 1.0 / jnp.sqrt(fan_in)
        w = jax.random.uniform(kw, (fan_in, fan_out), jnp.float32, -bound, bound)
        b = jax.random.uniform(kb, (1, fan_out), jnp.float32, -bound, bound)
        return w, b

    keys = jax.random.split(key, 6)
    w1, b1 = linear(keys[0], in_dim, fc1_dims)
    w2, b2 = linear(keys[1], fc1_dims, fc2_dims)
    wq1, bq1 = linear(keys[2], fc2_dims, 1)
    w3, b3 = linear(keys[3], in_dim, fc1_dims)
    w4, b4 = linear(keys[4], fc1_dims, fc2_dims)
    wq2, bq2 = linear(keys[5], fc2_dims, 1)
    return dict(w1=w1, b1=b1, w2=w2, b2=b2, wq1=wq1, bq1=bq1,
                w3=w3, b3=b3, w4=w4, b4=b4, wq2=wq2, bq2=bq2)


def _reference_forward(state, action, p):
    x = jnp.concatenate([state, action], axis=1)
    h = jax.nn.relu(x @ p["w1"] + p["b1"])
    h = jax.nn.relu(h @ p["w2"] + p["b2"])
    q1 = h @ p["wq1"] + p["bq1"]
    g = jax.nn.relu(x @ p["w3"] + p["b3"])
    g = jax.nn.relu(g @ p["w4"] + p["b4"])
    q2 = g @ p["wq2"] + p["bq2"]
    return q1, q2


if __name__ == "__main__":
    # Small shapes: input_dims=[16], n_actions=4, fc1_dims=fc2_dims=32.
    batch, state_dim, n_actions = 50, 16, 4
    fc1_dims, fc2_dims = 32, 32
    in_dim = state_dim + n_actions

    key = jax.random.PRNGKey(0)
    k_s, k_a, k_p, k_s2, k_a2 = jax.random.split(key, 5)
    state = jax.random.normal(k_s, (batch, state_dim), jnp.float32)
    action = jax.random.normal(k_a, (batch, n_actions), jnp.float32)
    params = init_params(k_p, in_dim, fc1_dims, fc2_dims)
    q1_ref, q2_ref = _reference_forward(state, action, params)

    # 1) fused (block-diag) path: 2*H = 64 <= 256, single grid step.
    packed = pack_params(params)
    q1, q2 = critic_forward(state, action, packed)
    jax.block_until_ready((q1, q2))
    assert q1.shape == (batch, 1) and q2.shape == (batch, 1)
    assert jnp.allclose(q1, q1_ref, atol=1e-4, rtol=1e-4)
    assert jnp.allclose(q2, q2_ref, atol=1e-4, rtol=1e-4)

    # 2) multi-step grid: lane-aligned tiles, >=2 "parallel" steps + padding.
    batch2 = 300
    state2 = jax.random.normal(k_s2, (batch2, state_dim), jnp.float32)
    action2 = jax.random.normal(k_a2, (batch2, n_actions), jnp.float32)
    q1_ref2, q2_ref2 = _reference_forward(state2, action2, params)
    q1b, q2b = critic_forward(state2, action2, packed)
    jax.block_until_ready((q1b, q2b))
    assert q1b.shape == (batch2, 1) and q2b.shape == (batch2, 1)
    assert jnp.allclose(q1b, q1_ref2, atol=1e-4, rtol=1e-4)
    assert jnp.allclose(q2b, q2_ref2, atol=1e-4, rtol=1e-4)

    # 3) split (zero-free two-branch) path, as real TD3 sizes (fc1=fc2=256)
    #    would take on a 256-wide MXU; forced here via a small mxu_width.
    packed_split = pack_params(params, mxu_width=32)
    assert not packed_split["fused"]
    q1c, q2c = critic_forward(state, action, packed_split)
    jax.block_until_ready((q1c, q2c))
    assert jnp.allclose(q1c, q1_ref, atol=1e-4, rtol=1e-4)
    assert jnp.allclose(q2c, q2_ref, atol=1e-4, rtol=1e-4)

    print("KERNEL_OK")
</pallas_src>

<mosaic_0001>
module attributes {stable_mosaic.version = 11 : i64} {
  func.func @_critic_kernel_fused(%arg0: i32, %arg1: memref<56x16xf32, #tpu.memory_space<vmem>>, %arg2: memref<56x4xf32, #tpu.memory_space<vmem>>, %arg3: memref<20x64xf32, #tpu.memory_space<vmem>>, %arg4: memref<1x64xf32, #tpu.memory_space<vmem>>, %arg5: memref<64x64xf32, #tpu.memory_space<vmem>>, %arg6: memref<1x64xf32, #tpu.memory_space<vmem>>, %arg7: memref<2x64xf32, #tpu.memory_space<vmem>>, %arg8: memref<2x1xf32, #tpu.memory_space<vmem>>, %arg9: memref<2x56xf32, #tpu.memory_space<vmem>>) attributes {dimension_semantics = [#tpu.dimension_semantics<parallel>], iteration_bounds = array<i64: 1>, scalar_prefetch = 0 : i64, scratch_operands = 0 : i64, tpu.core_type = #tpu.core_type<tc>, window_params = [{transform_indices = @transform_0, window_bounds = array<i64: 56, 16>}, {transform_indices = @transform_1, window_bounds = array<i64: 56, 4>}, {pipeline_mode = #tpu.pipeline_mode<synchronous>, transform_indices = @transform_2, window_bounds = array<i64: 20, 64>}, {pipeline_mode = #tpu.pipeline_mode<synchronous>, transform_indices = @transform_3, window_bounds = array<i64: 1, 64>}, {pipeline_mode = #tpu.pipeline_mode<synchronous>, transform_indices = @transform_4, window_bounds = array<i64: 64, 64>}, {pipeline_mode = #tpu.pipeline_mode<synchronous>, transform_indices = @transform_5, window_bounds = array<i64: 1, 64>}, {pipeline_mode = #tpu.pipeline_mode<synchronous>, transform_indices = @transform_6, window_bounds = array<i64: 2, 64>}, {pipeline_mode = #tpu.pipeline_mode<synchronous>, transform_indices = @transform_7, window_bounds = array<i64: 2, 1>}, {transform_indices = @transform_8, window_bounds = array<i64: 2, 56>}]} {
    %c0 = arith.constant 0 : index
    %c0_0 = arith.constant 0 : index
    %0 = vector.load %arg1[%c0, %c0_0] : memref<56x16xf32, #tpu.memory_space<vmem>>, vector<56x16xf32>
    %c0_1 = arith.constant 0 : index
    %c0_2 = arith.constant 0 : index
    %1 = vector.load %arg2[%c0_1, %c0_2] : memref<56x4xf32, #tpu.memory_space<vmem>>, vector<56x4xf32>
    %2 = tpu.concatenate %0, %1 in 1 : vector<56x16xf32>, vector<56x4xf32> -> vector<56x20xf32>
    %c0_3 = arith.constant 0 : index
    %c0_4 = arith.constant 0 : index
    %3 = vector.load %arg3[%c0_3, %c0_4] : memref<20x64xf32, #tpu.memory_space<vmem>>, vector<20x64xf32>
    %cst = arith.constant dense<0.000000e+00> : vector<56x64xf32>
    %4 = tpu.matmul %2, %3, %cst {dimension_numbers = #tpu.dot_dimension_numbers<[1], [0], [0], [1], [0, 0, 1, 1], [], []>} : vector<56x20xf32>, vector<20x64xf32>, vector<56x64xf32> -> vector<56x64xf32>
    %c0_5 = arith.constant 0 : index
    %c0_6 = arith.constant 0 : index
    %5 = vector.load %arg4[%c0_5, %c0_6] : memref<1x64xf32, #tpu.memory_space<vmem>>, vector<1x64xf32>
    %6 = vector.broadcast %5 : vector<1x64xf32> to vector<56x64xf32>
    %7 = arith.addf %4, %6 : vector<56x64xf32>
    %cst_7 = arith.constant 0.000000e+00 : f32
    %8 = vector.broadcast %cst_7 : f32 to vector<56x64xf32>
    %9 = arith.maximumf %7, %8 : vector<56x64xf32>
    %c0_8 = arith.constant 0 : index
    %c0_9 = arith.constant 0 : index
    %10 = vector.load %arg5[%c0_8, %c0_9] : memref<64x64xf32, #tpu.memory_space<vmem>>, vector<64x64xf32>
    %cst_10 = arith.constant dense<0.000000e+00> : vector<56x64xf32>
    %11 = tpu.matmul %9, %10, %cst_10 {dimension_numbers = #tpu.dot_dimension_numbers<[1], [0], [0], [1], [0, 0, 1, 1], [], []>} : vector<56x64xf32>, vector<64x64xf32>, vector<56x64xf32> -> vector<56x64xf32>
    %c0_11 = arith.constant 0 : index
    %c0_12 = arith.constant 0 : index
    %12 = vector.load %arg6[%c0_11, %c0_12] : memref<1x64xf32, #tpu.memory_space<vmem>>, vector<1x64xf32>
    %13 = vector.broadcast %12 : vector<1x64xf32> to vector<56x64xf32>
    %14 = arith.addf %11, %13 : vector<56x64xf32>
    %cst_13 = arith.constant 0.000000e+00 : f32
    %15 = vector.broadcast %cst_13 : f32 to vector<56x64xf32>
    %16 = arith.maximumf %14, %15 : vector<56x64xf32>
    %c0_14 = arith.constant 0 : index
    %c0_15 = arith.constant 0 : index
    %17 = vector.load %arg7[%c0_14, %c0_15] : memref<2x64xf32, #tpu.memory_space<vmem>>, vector<2x64xf32>
    %cst_16 = arith.constant dense<0.000000e+00> : vector<2x56xf32>
    %18 = tpu.matmul %17, %16, %cst_16 {dimension_numbers = #tpu.dot_dimension_numbers<[1], [1], [0], [0], [0, 0, 1, 0], [], []>} : vector<2x64xf32>, vector<56x64xf32>, vector<2x56xf32> -> vector<2x56xf32>
    %c0_17 = arith.constant 0 : index
    %c0_18 = arith.constant 0 : index
    %19 = vector.load %arg8[%c0_17, %c0_18] : memref<2x1xf32, #tpu.memory_space<vmem>>, vector<2x1xf32>
    %20 = vector.broadcast %19 : vector<2x1xf32> to vector<2x56xf32>
    %21 = arith.addf %18, %20 : vector<2x56xf32>
    %c0_19 = arith.constant 0 : index
    %c0_20 = arith.constant 0 : index
    %22 = vector.load %arg9[%c0_19, %c0_20] : memref<2x56xf32, #tpu.memory_space<vmem>>, vector<2x56xf32>
    tpu.vector_store %arg9[%c0_19, %c0_20], %21 {strides = array<i32>} : memref<2x56xf32, #tpu.memory_space<vmem>>, vector<2x56xf32>,
    return
  }
  func.func @transform_0(%arg0: i32) -> (i32, i32) {
    %c0_i32 = arith.constant 0 : i32
    %c0_i32_0 = arith.constant 0 : i32
    return %arg0, %c0_i32 : i32, i32
  }
  func.func @transform_1(%arg0: i32) -> (i32, i32) {
    %c0_i32 = arith.constant 0 : i32
    %c0_i32_0 = arith.constant 0 : i32
    return %arg0, %c0_i32 : i32, i32
  }
  func.func @transform_2(%arg0: i32) -> (i32, i32) {
    %c0_i32 = arith.constant 0 : i32
    %c0_i32_0 = arith.constant 0 : i32
    %c0_i32_1 = arith.constant 0 : i32
    return %c0_i32, %c0_i32_0 : i32, i32
  }
  func.func @transform_3(%arg0: i32) -> (i32, i32) {
    %c0_i32 = arith.constant 0 : i32
    %c0_i32_0 = arith.constant 0 : i32
    %c0_i32_1 = arith.constant 0 : i32
    return %c0_i32, %c0_i32_0 : i32, i32
  }
  func.func @transform_4(%arg0: i32) -> (i32, i32) {
    %c0_i32 = arith.constant 0 : i32
    %c0_i32_0 = arith.constant 0 : i32
    %c0_i32_1 = arith.constant 0 : i32
    return %c0_i32, %c0_i32_0 : i32, i32
  }
  func.func @transform_5(%arg0: i32) -> (i32, i32) {
    %c0_i32 = arith.constant 0 : i32
    %c0_i32_0 = arith.constant 0 : i32
    %c0_i32_1 = arith.constant 0 : i32
    return %c0_i32, %c0_i32_0 : i32, i32
  }
  func.func @transform_6(%arg0: i32) -> (i32, i32) {
    %c0_i32 = arith.constant 0 : i32
    %c0_i32_0 = arith.constant 0 : i32
    %c0_i32_1 = arith.constant 0 : i32
    return %c0_i32, %c0_i32_0 : i32, i32
  }
  func.func @transform_7(%arg0: i32) -> (i32, i32) {
    %c0_i32 = arith.constant 0 : i32
    %c0_i32_0 = arith.constant 0 : i32
    %c0_i32_1 = arith.constant 0 : i32
    return %c0_i32, %c0_i32_0 : i32, i32
  }
  func.func @transform_8(%arg0: i32) -> (i32, i32) {
    %c0_i32 = arith.constant 0 : i32
    %c0_i32_0 = arith.constant 0 : i32
    return %c0_i32, %arg0 : i32, i32
  }
}

</mosaic_0001>

<bundles_post_ra>
// kernel: _run_kernel.1
= control target key start
LH: loop header
LB: loop body
LE: loop exit
PB: predicated region body
PF: predicated region fallthrough
CT: control target
= control target key end

     0   :  { %v646_v2 = vmov 0.0|0.0   ;;  %s647_s9 = smov 16   ;;  %vm648_vm0 = vmmov 0   ;;  %v649_v6 = vmov 0.0   ;;  %vm111_vm1 = vcmask 1043456   ;;  %s861_s1 = inlined_call_operand.vmem [shape: f32[56,4], index: 1, kind: input, shape index: {}]   ;;  %s862_s2 = inlined_call_operand.vmem [shape: f32[20,64], index: 2, kind: input, shape index: {}]   ;;  %s863_s4 = inlined_call_operand.vmem [shape: f32[64,64], index: 4, kind: input, shape index: {}]   ;;  %s864_s0 = inlined_call_operand.vmem [shape: f32[56,16], index: 0, kind: input, shape index: {}]   ;;  %s865_s3 = inlined_call_operand.vmem [shape: f32[1,64], index: 3, kind: input, shape index: {}]   ;;  %s866_s7 = inlined_call_operand.vmem [shape: f32[2,1], index: 7, kind: input, shape index: {}]   ;;  %s867_s5 = inlined_call_operand.vmem [shape: f32[1,64], index: 5, kind: input, shape index: {}]   ;;  %s868_s6 = inlined_call_operand.vmem [shape: f32[2,64], index: 6, kind: input, shape index: {}]   ;;  %s869_s8 = inlined_call_operand.vmem [shape: f32[2,56], index: 8, kind: output, shape index: {}]  }
   0x1   :  { %v36_v0 = vld [vmem:[%s861_s1] sm:$0xff]  ;;  %v38_v1 = vld [vmem:[%s861_s1 + $0x10] sm:$0xff]  ;;  %612 = vmatprep.subr.bf16.mxu0 %v646_v2  ;;  %615 = vmatprep.subr.bf16.mxu1 %v646_v2  ;;  %v37_v3 = vld [vmem:[%s861_s1 + $0x8] sm:$0xff]  ;;  %vm71_vm2 = vcmask 130048   ;;  %vm89_vm3 = vcmask 162816   ;;  %vm237_vm4 = vcmask 523264  }
   0x2   :  { %50 = vrot.lane.b32.xlu0 %v36_v0, %s647_s9  ;;  %54 = vrot.lane.b32.xlu1 %v38_v1, %s647_s9  ;;  %v39_v4 = vld [vmem:[%s861_s1 + $0x18] sm:$0xff]  ;;  %v79_v5 = vld [vmem:[%s862_s2] sm:$0xff]  ;;  %vm840_vm5 = vmpackc.low %vm237_vm4, %vm237_vm4  ;;  %vm467_vm6 = vcmask 451584  }
   0x3   :  { %537 = vmatprep.mubr.msk.f32.mxu0 %vm648_vm0, %v649_v6  ;;  %574 = vmatprep.mubr.msk.f32.mxu1 %vm648_vm0, %v649_v6  ;;  %v80_v7 = vld [vmem:[%s862_s2 + $0x8] sm:$0xff]  ;;  %v40_v9 = vld [vmem:[%s861_s1 + $0x20] sm:$0xff]  ;;  %v81_v11 = vld [vmem:[%s862_s2 + $0x10] sm:$0xf] }
   0x4   :  { %v613_v8 = vpack.c.bf16 %v80_v7, %v79_v5  ;;  %v41_v10 = vld [vmem:[%s861_s1 + $0x28] sm:$0xff]  ;;  %v42_v12 = vld [vmem:[%s861_s1 + $0x30] sm:$0xff]  ;;  %v222_v13 = vld [vmem:[%s863_s4] sm:$0xff] }
   0x5   :  { %v223_v14 = vld [vmem:[%s863_s4 + $0x8] sm:$0xff]  ;;  %v224_v15 = vld [vmem:[%s863_s4 + $0x10] sm:$0xff]  ;;  %v225_v17 = vld [vmem:[%s863_s4 + $0x18] sm:$0xff] }
   0x6   :  { %52 = vrot.lane.b32.xlu0 %v37_v3, %s647_s9  ;;  %56 = vrot.lane.b32.xlu1 %v39_v4, %s647_s9  ;;  %v616_v16 = vpack.c.bf16 %v223_v14, %v222_v13  ;;  %v619_v18 = vpack.c.bf16 %v225_v17, %v224_v15  ;;  %v226_v19 = vld [vmem:[%s863_s4 + $0x20] sm:$0xff]  ;;  %v227_v20 = vld [vmem:[%s863_s4 + $0x28] sm:$0xff]  ;;  %v650_v13 = vmov 0  }
   0x7   :  { %614 = vmatpush3.bf16.msra.mxu0 %v613_v8  ;;  %v622_v21 = vpack.c.bf16 %v227_v20, %v226_v19  ;;  %v29_v22 = vld [vmem:[%s864_s0] sm:$0xff]  ;;  %v30_v25 = vld [vmem:[%s864_s0 + $0x8] sm:$0xff]  ;;  %v31_v28 = vld [vmem:[%s864_s0 + $0x10] sm:$0xff]  ;;  %644 = vset.pattern.permute.xlu1 %v650_v13 }
   0x8   :  { %535 = vmatprep.subr.mxu0 %v649_v6  ;;  %617 = vmatpush3.bf16.msra.mxu1 %v616_v16  ;;  %v32_v32 = vld [vmem:[%s864_s0 + $0x18] sm:$0xff]  ;;  %v33_v35 = vld [vmem:[%s864_s0 + $0x20] sm:$0xff]  ;;  %v34_v38 = vld [vmem:[%s864_s0 + $0x28] sm:$0xff] }
   0x9   :  { %618 = vmatprep.subr.bf16.mxu1 %v646_v2  ;;  %v35_v41 = vld [vmem:[%s864_s0 + $0x30] sm:$0xff]  ;;  %v229_v44 = vld [vmem:[%s863_s4 + $0x38] sm:$0xff]  ;;  %v473_v46 = vld [vmem:[%s865_s3] ss:$0 sm:$0xff]  ;;  %645 = vset.pattern.permute.xlu0 %v650_v13 }
   0xa   :  { %58 = vrot.lane.b32.xlu0 %v40_v9, %s647_s9  ;;  %60 = vrot.lane.b32.xlu1 %v41_v10, %s647_s9  ;;  %v228_v43 = vld [vmem:[%s863_s4 + $0x30] sm:$0xff]  ;;  %v367_v14 = vld [vmem:[%s866_s7] sm:$0x3] }
   0xb   :  { %536 = vmatpush3.msk.msra.mxu0 %vm111_vm1, %v81_v11  ;;  %v625_v45 = vpack.c.bf16 %v229_v44, %v228_v43  ;;  %v482_v15 = vld [vmem:[%s867_s5] ss:$0 sm:$0xff] }
   0xc   :  { %627 = vmatprep.subr.bf16.mxu0 %v646_v2  ;;  %620 = vmatpush3.bf16.msra.mxu1 %v619_v18 }
   0xd   :  { %621 = vmatprep.subr.bf16.mxu1 %v646_v2 }
   0xe   :  { %62 = vrot.lane.b32.xlu0 %v42_v12, %s647_s9  ;;  %370 = vperm.xlu1 %644, %v367_v14  }
  0x10   :  { %623 = vmatpush3.bf16.msra.mxu1 %v622_v21 }
  0x11   :  { %624 = vmatprep.subr.bf16.mxu1 %v646_v2 }
  0x14   :  { %626 = vmatpush3.bf16.msra.mxu1 %v625_v45 }
  0x74   :  { %v51_v23 = vpop.permute.xlu0 %50  ;;  %v55_v26 = vpop.permute.xlu1 %54 }
  0x75   :  { %v72_v24 = vsel %vm71_vm2, %v29_v22, %v51_v23  ;;  %v74_v30 = vsel %vm71_vm2, %v31_v28, %v55_v26 }
  0x76   :  { %538 = vmatmul.mubr.msk.f32.vlgmr.msra.gmra.mrb[0].mxu0 %vm89_vm3, %v72_v24 }
  0x77   :  { %540 = vmatprep.mubr.msk.f32.mxu0 %vm648_vm0, %v649_v6 }
  0x78   :  { %v53_v27 = vpop.permute.xlu0 %52  ;;  %v57_v31 = vpop.permute.xlu1 %56 }
  0x79   :  { %v73_v29 = vsel %vm71_vm2, %v30_v25, %v53_v27  ;;  %v75_v33 = vsel %vm71_vm2, %v32_v32, %v57_v31 }
  0x7a   :  { %541 = vmatmul.mubr.msk.f32.gmra.mrb[2].mxu0 %vm89_vm3, %v73_v29 }
  0x7b   :  { %543 = vmatprep.mubr.msk.f32.mxu0 %vm648_vm0, %v649_v6 }
  0x7c   :  { %v59_v34 = vpop.permute.xlu0 %58  ;;  %v61_v37 = vpop.permute.xlu1 %60 }
  0x7d   :  { %v76_v36 = vsel %vm71_vm2, %v33_v35, %v59_v34  ;;  %v77_v39 = vsel %vm71_vm2, %v34_v38, %v61_v37 }
  0x7e   :  { %544 = vmatmul.mubr.msk.f32.gmra.mrb[4].mxu0 %vm89_vm3, %v74_v30 }
  0x7f   :  { %546 = vmatprep.mubr.msk.f32.mxu0 %vm648_vm0, %v649_v6 }
  0x80   :  { %v63_v40 = vpop.permute.xlu0 %62 }
  0x81   :  { %v78_v42 = vsel %vm71_vm2, %v35_v41, %v63_v40 }
  0x82   :  { %547 = vmatmul.mubr.msk.f32.gmra.mrb[6].mxu0 %vm89_vm3, %v75_v33 }
  0x83   :  { %549 = vmatprep.mubr.msk.f32.mxu0 %vm648_vm0, %v649_v6 }
  0x86   :  { %550 = vmatmul.mubr.msk.f32.gmra.mrb[8].mxu0 %vm89_vm3, %v76_v36 }
  0x87   :  { %552 = vmatprep.mubr.msk.f32.mxu0 %vm648_vm0, %v649_v6 }
  0x8a   :  { %553 = vmatmul.mubr.msk.f32.gmra.mrb[10].mxu0 %vm89_vm3, %v77_v39 }
  0x8b   :  { %555 = vmatprep.mubr.msk.f32.mxu0 %vm648_vm0, %v649_v6 }
  0x8e   :  { %556 = vmatmul.mubr.msk.f32.gmra.mrb[12].mxu0 %vm89_vm3, %v78_v42 }
  0x8f   :  { %609 = vmatprep.mubr.msk.f32.mxu0 %vm648_vm0, %v649_v6 }
 0x149   :  { %v181_v47 = vpop.f32.mrb[0].mxu0 }
 0x14a   :  { %v182_v48 = vadd.f32 %v473_v46, %v181_v47  ;;  %v539_v49 = vpop.f32.mrb[1].mxu0 }
 0x14c   :  { %v215_v50 = vmax.f32 %v182_v48, 0.0  ;;  %v371_v48 = vpop.permute.xlu1 %370 }
 0x14d   :  { %v186_v51 = vpop.f32.mrb[2].mxu0 }
 0x14e   :  { %v187_v52 = vadd.f32 %v473_v46, %v186_v51  ;;  %v542_v53 = vpop.f32.mrb[3].mxu0  ;;  %575 = vmatmul.mubr.msk.f32.vlgmr.msra.gmra.mrb[0].mxu1 %vm237_vm4, %v215_v50 }
 0x14f   :  { %577 = vmatprep.mubr.msk.f32.mxu1 %vm648_vm0, %v649_v6 }
 0x150   :  { %v216_v54 = vmax.f32 %v187_v52, 0.0 }
 0x151   :  { %v191_v55 = vpop.f32.mrb[4].mxu0 }
 0x152   :  { %v192_v56 = vadd.f32 %v473_v46, %v191_v55  ;;  %v545_v57 = vpop.f32.mrb[5].mxu0  ;;  %578 = vmatmul.mubr.msk.f32.gmra.mrb[2].mxu1 %vm237_vm4, %v216_v54 }
 0x153   :  { %580 = vmatprep.mubr.msk.f32.mxu1 %vm648_vm0, %v649_v6 }
 0x154   :  { %v217_v58 = vmax.f32 %v192_v56, 0.0 }
 0x155   :  { %v196_v59 = vpop.f32.mrb[6].mxu0 }
 0x156   :  { %v197_v60 = vadd.f32 %v473_v46, %v196_v59  ;;  %v548_v61 = vpop.f32.mrb[7].mxu0  ;;  %581 = vmatmul.mubr.msk.f32.gmra.mrb[4].mxu1 %vm237_vm4, %v217_v58 }
 0x157   :  { %583 = vmatprep.mubr.msk.f32.mxu1 %vm648_vm0, %v649_v6 }
 0x158   :  { %v218_v62 = vmax.f32 %v197_v60, 0.0 }
 0x159   :  { %v201_v63 = vpop.f32.mrb[8].mxu0 }
 0x15a   :  { %v202_v0 = vadd.f32 %v473_v46, %v201_v63  ;;  %v551_v1 = vpop.f32.mrb[9].mxu0  ;;  %584 = vmatmul.mubr.msk.f32.gmra.mrb[6].mxu1 %vm237_vm4, %v218_v62 }
 0x15b   :  { %586 = vmatprep.mubr.msk.f32.mxu1 %vm648_vm0, %v649_v6 }
 0x15c   :  { %v219_v3 = vmax.f32 %v202_v0, 0.0 }
 0x15d   :  { %v206_v4 = vpop.f32.mrb[10].mxu0 }
 0x15e   :  { %v207_v5 = vadd.f32 %v473_v46, %v206_v4  ;;  %v554_v7 = vpop.f32.mrb[11].mxu0  ;;  %587 = vmatmul.mubr.msk.f32.gmra.mrb[8].mxu1 %vm237_vm4, %v219_v3 }
 0x15f   :  { %589 = vmatprep.mubr.msk.f32.mxu1 %vm648_vm0, %v649_v6 }
 0x160   :  { %v220_v8 = vmax.f32 %v207_v5, 0.0 }
 0x161   :  { %v211_v9 = vpop.f32.mrb[12].mxu0 }
 0x162   :  { %590 = vmatmul.mubr.msk.f32.gmra.mrb[10].mxu1 %vm237_vm4, %v220_v8  ;;  %v212_v10 = vadd.f32 %v473_v46, %v211_v9  ;;  %v557_v11 = vpop.f32.mrb[13].mxu0 }
 0x163   :  { %592 = vmatprep.mubr.msk.f32.mxu1 %vm648_vm0, %v649_v6 }
 0x164   :  { %v221_v12 = vmax.f32 %v212_v10, 0.0 }
 0x166   :  { %593 = vmatmul.mubr.msk.f32.gmra.mrb[12].mxu1 %vm237_vm4, %v221_v12 }
 0x221   :  { %v325_v16 = vpop.f32.mrb[0].mxu1 }
 0x222   :  { %v576_v17 = vpop.f32.mrb[1].mxu1  ;;  %v326_v18 = vadd.f32 %v482_v15, %v325_v16 }
 0x224   :  { %v359_v22 = vmax.f32 %v326_v18, 0.0 }
 0x225   :  { %v330_v19 = vpop.f32.mrb[2].mxu1 }
 0x226   :  { %v331_v20 = vadd.f32 %v482_v15, %v330_v19  ;;  %v579_v21 = vpop.f32.mrb[3].mxu1 }
 0x228   :  { %v360_v23 = vmax.f32 %v331_v20, 0.0 }
 0x229   :  { %v335_v24 = vpop.f32.mrb[4].mxu1 }
 0x22a   :  { %v628_v26 = vpack.c.bf16 %v360_v23, %v359_v22  ;;  %v582_v27 = vpop.f32.mrb[5].mxu1  ;;  %v336_v28 = vadd.f32 %v482_v15, %v335_v24 }
 0x22c   :  { %630 = vmatpush3.bf16.xpose.msk.msra.mxu0 %vm840_vm5, %v628_v26  ;;  %v361_v32 = vmax.f32 %v336_v28, 0.0 }
 0x22d   :  { %v340_v29 = vpop.f32.mrb[6].mxu1  ;;  %631 = vmatprep.subr.bf16.mxu0 %v646_v2 }
 0x22e   :  { %v341_v30 = vadd.f32 %v482_v15, %v340_v29  ;;  %v585_v31 = vpop.f32.mrb[7].mxu1 }
 0x230   :  { %v362_v33 = vmax.f32 %v341_v30, 0.0 }
 0x231   :  { %v345_v34 = vpop.f32.mrb[8].mxu1 }
 0x232   :  { %v632_v35 = vpack.c.bf16 %v362_v33, %v361_v32  ;;  %v588_v36 = vpop.f32.mrb[9].mxu1  ;;  %v346_v37 = vadd.f32 %v482_v15, %v345_v34 }
 0x234   :  { %634 = vmatpush3.bf16.xpose.msk.msra.mxu0 %vm840_vm5, %v632_v35  ;;  %v363_v41 = vmax.f32 %v346_v37, 0.0 }
 0x235   :  { %v350_v38 = vpop.f32.mrb[10].mxu1  ;;  %635 = vmatprep.subr.bf16.mxu0 %v646_v2  ;;  %v366_v2 = vld [vmem:[%s868_s6] sm:$0x3] }
 0x236   :  { %v351_v39 = vadd.f32 %v482_v15, %v350_v38  ;;  %v591_v40 = vpop.f32.mrb[11].mxu1 }
 0x238   :  { %v364_v42 = vmax.f32 %v351_v39, 0.0 }
 0x239   :  { %v355_v43 = vpop.f32.mrb[12].mxu1 }
 0x23a   :  { %v636_v44 = vpack.c.bf16 %v364_v42, %v363_v41  ;;  %v594_v45 = vpop.f32.mrb[13].mxu1  ;;  %v356_v46 = vadd.f32 %v482_v15, %v355_v43 }
 0x23c   :  { %638 = vmatpush3.bf16.xpose.msk.msra.mxu0 %vm840_vm5, %v636_v44  ;;  %v365_v47 = vmax.f32 %v356_v46, 0.0 }
 0x23d   :  { %607 = vmatprep.subr.mxu0 %v649_v6 }
 0x244   :  { %608 = vmatpush3.xpose.msk.msra.mxu0 %vm237_vm4, %v365_v47 }
 0x247   :  { %610 = vmatmul.mubr.msk.f32.vlgmr.msra.gmra.mrb[14].mxu0 %vm237_vm4, %v366_v2 }
 0x31a   :  { %v463_v49 = vpop.f32.mrb[14].mxu0 }
 0x31b   :  { %v464_v50 = vadd.f32 %v463_v49, %v371_v48  ;;  %v611_v51 = vpop.f32.mrb[15].mxu0 }
 0x31d   :  { %468 = vst.msk [vmem:[%s869_s8] sm:$0x3] %vm467_vm6, %v464_v50 }

</bundles_post_ra>
